<compile_context>
chip_gen: v5e
topology: v5e:2x2
jax: 0.10.0
libtpu: 0.0.40
codegen_flags: <defaults>
</compile_context>

<pallas_src>
import functools

import jax
import jax.numpy as jnp
from jax import lax
from jax.experimental import pallas as pl
from jax.experimental.pallas import tpu as pltpu


def _round_up(x, m):
    return ((x + m - 1) // m) * m


def _pick_tile(a_pad):
    """Largest lane-dense tile in {2048..128} dividing a_pad, preferring >=2 tiles."""
    for t in (2048, 1024, 512, 256, 128):
        if a_pad % t == 0 and a_pad // t >= 2:
            return t
    return a_pad  # a_pad == 128: single tile, cannot split further


def _tpu_vmem_limit(estimate_bytes):
    """Generation-aware scoped-VMEM cap (~75% of physical), never below default."""
    try:
        cap = int(pltpu.get_tpu_info().vmem_capacity_bytes)
    except Exception:          # pragma: no cover - conservative fallback
        cap = 64 << 20
    return int(min(max(estimate_bytes, 32 << 20), cap * 3 // 4))


# ---------------------------------------------------------------------------
# shared elementwise helpers (gt rows on sublanes, anchors on lanes)
# ---------------------------------------------------------------------------
def _centers_is_in(stride, grid_t, tgt):
    """(Gb, T) bool: anchor center within +-1.5*stride of the gt center."""
    x_c = (grid_t[0:1, :] + 0.5) * stride          # (1, T)
    y_c = (grid_t[1:2, :] + 0.5) * stride
    cdist = stride * 1.5
    gt_cx = tgt[:, 1:2]                            # (Gb, 1)
    gt_cy = tgt[:, 2:3]
    c_l = x_c - (gt_cx - cdist)
    c_r = (gt_cx + cdist) - x_c
    c_t = y_c - (gt_cy - cdist)
    c_b = (gt_cy + cdist) - y_c
    return (c_l > 0.0) & (c_r > 0.0) & (c_t > 0.0) & (c_b > 0.0)


def _pairwise_iou(out_t, tgt):
    """(Gb, T) clamped IoU between gt boxes and predicted boxes (cxcywh)."""
    box_x = out_t[0:1, :]
    box_y = out_t[1:2, :]
    box_w = out_t[2:3, :]
    box_h = out_t[3:4, :]
    gt_cx = tgt[:, 1:2]
    gt_cy = tgt[:, 2:3]
    gt_w = tgt[:, 3:4]
    gt_h = tgt[:, 4:5]
    tl_x = jnp.maximum(gt_cx - gt_w * 0.5, box_x - box_w * 0.5)
    tl_y = jnp.maximum(gt_cy - gt_h * 0.5, box_y - box_h * 0.5)
    br_x = jnp.minimum(gt_cx + gt_w * 0.5, box_x + box_w * 0.5)
    br_y = jnp.minimum(gt_cy + gt_h * 0.5, box_y + box_h * 0.5)
    en = ((tl_x < br_x) & (tl_y < br_y)).astype(jnp.float32)
    area_i = (br_x - tl_x) * (br_y - tl_y) * en
    area_a = gt_w * gt_h                            # (Gb, 1)
    area_b = box_w * box_h                          # (1, T)
    iou = area_i / (area_a + area_b - area_i + 1e-9)
    return jnp.clip(iou, 0.0, 1.0)


def _cls_cost(out_t):
    """(1, T) BCE-against-ones of sqrt(cls*obj)*mask (log clamped like F.bce)."""
    obj_l = out_t[4:5, :]
    cls_l = out_t[5:6, :]
    msk_l = out_t[6:7, :]
    p = jnp.sqrt(jax.nn.sigmoid(cls_l) * jax.nn.sigmoid(obj_l)) * jax.nn.sigmoid(msk_l)
    return -jnp.maximum(jnp.log(p), -100.0)


# ---------------------------------------------------------------------------
# pass F: global anchor_filter (any gt's geometry hit), parallel over tiles
# ---------------------------------------------------------------------------
def _filter_kernel(stride_ref, grid_t_ref, tgt_ref, af_ref):
    is_in = _centers_is_in(stride_ref[0], grid_t_ref[...], tgt_ref[...])
    af_ref[...] = (jnp.sum(is_in.astype(jnp.int32), axis=0, keepdims=True) > 0
                   ).astype(jnp.float32)


# ---------------------------------------------------------------------------
# pass B: per-gt dynamic_k selection -> selected anchor indices, parallel
#         over gt-blocks of 8 (cost/IoU recomputed; no (G, A) HBM intermediate)
# ---------------------------------------------------------------------------
def _select_kernel(stride_ref, n_gt_ref, out_t_ref, grid_t_ref, af_ref, tgt_ref,
                   sel_ref, *, n_candidate_k):
    f32 = jnp.float32
    stride = stride_ref[0]
    out_t = out_t_ref[...]            # (7, A) full anchor axis (resident, const block)
    grid_t = grid_t_ref[...]          # (2, A)
    af = af_ref[...]                  # (1, A) global anchor filter
    tgt = tgt_ref[...]                # (GB, 5) this gt block

    is_in = _centers_is_in(stride, grid_t, tgt)                  # (GB, A)
    iou = _pairwise_iou(out_t, tgt)                              # (GB, A)
    iou_m = iou * af                  # zero IoU outside the filter (dynamic_k)
    # NOTE: the +1e8 additive mask quantizes cost differences among filtered-out
    # anchors (ulp ~ 8 at 1e8) - harmless, they can never win.
    cost = (_cls_cost(out_t)
            + 3.0 * (-jnp.log(iou + 1e-8))
            + 1.0e6 * (1.0 - is_in.astype(f32))
            + 1.0e8 * (1.0 - af))                                # (GB, A)

    GB, A = cost.shape
    lane = lax.broadcasted_iota(jnp.int32, (GB, A), 1)
    lane128 = lax.broadcasted_iota(jnp.int32, (GB, 128), 1)

    # ---- dynamic_ks = clamp(int(sum of top-k IoU), min=1) ------------------
    def iou_body(_, carry):
        work, s = carry
        m = jnp.max(work, axis=1, keepdims=True)                 # (GB, 1)
        amax = jnp.min(jnp.where(work == m, lane, A), axis=1, keepdims=True)
        return jnp.where(lane == amax, jnp.float32(-1.0), work), s + m

    _, topk_sum = lax.fori_loop(0, n_candidate_k, iou_body,
                                (iou_m, jnp.zeros((GB, 1), f32)), unroll=True)
    dynamic_ks = jnp.maximum(topk_sum.astype(jnp.int32), 1)      # (GB, 1)

    # ---- extract the n_candidate_k smallest-cost anchor indices, in order --
    # (independent of dynamic_ks -> the two extraction chains interleave)
    def cost_body(t, carry):
        work, sel = carry
        cmin = jnp.min(work, axis=1, keepdims=True)              # (GB, 1)
        imin = jnp.min(jnp.where(work == cmin, lane, A), axis=1, keepdims=True)
        sel = jnp.where(lane128 == t, imin.astype(f32), sel)
        return jnp.where(lane == imin, jnp.float32(3.0e38), work), sel

    _, sel = lax.fori_loop(0, n_candidate_k, cost_body,
                           (cost, jnp.full((GB, 128), -1.0, f32)), unroll=True)

    # keep only the first dynamic_k picks, and only real (non-padded) gt rows
    row = lax.broadcasted_iota(jnp.int32, (GB, 128), 0) + pl.program_id(0) * GB
    valid = (row < n_gt_ref[0]) & (lane128 < dynamic_ks)
    sel_ref[...] = jnp.where(valid, sel, jnp.float32(-1.0))


# ---------------------------------------------------------------------------
# pass C: matching from the selected indices + conflict resolution,
#         parallel over anchor tiles (IoU/geometry recomputed, no cost/log)
# ---------------------------------------------------------------------------
def _match_kernel(stride_ref, sel_ref, out_t_ref, grid_t_ref, af_ref, tgt_ref,
                  out_ref, *, n_candidate_k):
    f32 = jnp.float32
    stride = stride_ref[0]
    out_t = out_t_ref[...]            # (7, T)
    grid_t = grid_t_ref[...]          # (2, T)
    af = af_ref[...]                  # (1, T)
    tgt = tgt_ref[...]                # (Gp, 5) padded rows are far away
    sel = sel_ref[...]                # (Gp, 128) selected anchor indices, -1 unused

    is_in_f = _centers_is_in(stride, grid_t, tgt).astype(f32)    # (Gp, T)
    iou = _pairwise_iou(out_t, tgt)                              # (Gp, T)
    iou_m = iou * af

    Gp, T = iou.shape
    base = pl.program_id(0) * T
    lane = lax.broadcasted_iota(jnp.int32, (Gp, T), 1) + base    # global anchor idx

    # matching <=> this anchor's global index is one of the gt's selected indices
    matching = jnp.zeros((Gp, T), jnp.bool_)
    for t in range(n_candidate_k):                               # <= 10 static compares
        matching = matching | (lane == sel[:, t:t + 1].astype(jnp.int32))
    matching = matching.astype(jnp.int32)

    # ---- resolve anchors matched to several gts -----------------------------
    anchor_matching_gt = jnp.sum(matching, axis=0, keepdims=True)   # (1, T)
    conflict = anchor_matching_gt > 1
    gt_iota = lax.broadcasted_iota(jnp.int32, (Gp, T), 0)
    # Order-equivalent surrogate for argmin_g cost[g, a]: cls/obj/mask loss and
    # the anchor-filter bump are constant across gts, and -log(iou + eps) is
    # strictly decreasing in iou, so argmin_g cost == argmin_g (1e6*(1-is_in) - iou).
    # Padded gt rows give key == 1e6 exactly and can never strictly beat a real
    # gt (ties break to the lower, i.e. real, index) -> no log/EUP work here.
    key = 1.0e6 * (1.0 - is_in_f) - iou
    kmin = jnp.min(key, axis=0, keepdims=True)
    argmin = jnp.min(jnp.where(key == kmin, gt_iota, Gp), axis=0, keepdims=True)
    matching = jnp.where(conflict, (gt_iota == argmin).astype(jnp.int32), matching)

    fg = (anchor_matching_gt > 0).astype(f32)                        # (1, T)
    has_match = jnp.sum(matching, axis=0, keepdims=True) > 0
    first_gt = jnp.min(jnp.where(matching > 0, gt_iota, Gp), axis=0, keepdims=True)
    mgt = jnp.where(has_match, first_gt, 0).astype(f32)
    piou = jnp.sum(matching.astype(f32) * iou_m, axis=0, keepdims=True)

    # one dense (8, T) slab: row0=fg, row1=matched_gt, row2=pred_iou
    sub = lax.broadcasted_iota(jnp.int32, (8, T), 0)
    slab = jnp.where(sub == 0, fg, jnp.float32(0.0))
    slab = jnp.where(sub == 1, mgt, slab)
    slab = jnp.where(sub == 2, piou, slab)
    out_ref[...] = slab


def topk_assign(output, target, grid, stride):
    """Dense SimOTA assignment.

    output: (A, 7) [cx, cy, w, h, obj_logit, cls_logit, mask_logit]
    target: (G, 5) [cls, cx, cy, w, h]
    grid:   (A, 2) grid cell coordinates (float)
    stride: scalar stride of this FPN level

    Returns (fg_mask(A,), pred_ious(A,), matched_gt_inds(A,), num_fg, num_gt).
    pred_ious / matched_gt_inds are dense per-anchor; only entries where
    fg_mask is True are meaningful (PyTorch returns the gathered versions).
    """
    # TODO(synk): PyTorch returns variable-length tensors gathered by fg_mask;
    # dynamic-shape boolean gather has no jit/Pallas equivalent, so dense
    # per-anchor arrays + fg_mask are returned instead.
    A = int(output.shape[0])
    G = int(target.shape[0])
    out_t = jnp.asarray(output, jnp.float32).T              # (7, A)
    grid_t = jnp.asarray(grid, jnp.float32).T               # (2, A)
    tgt = jnp.asarray(target, jnp.float32)                  # (G, 5)
    stride_arr = jnp.asarray(stride, jnp.float32).reshape((1,))
    n_gt_arr = jnp.full((1,), G, jnp.int32)

    # ---- anchor tiling: only pad to 128, pick a tile that divides A_pad -----
    A_pad = _round_up(A, 128)
    assert A_pad < (1 << 24), "anchor indices are carried exactly in float32"
    tile = _pick_tile(A_pad)
    n_tiles = A_pad // tile
    if A_pad != A:
        pad = A_pad - A
        out_t = jnp.pad(out_t, ((0, 0), (0, pad)))
        grid_t = jnp.pad(grid_t, ((0, 0), (0, pad)), constant_values=-1.0e6)

    # ---- gt padding to blocks of 8 (padded rows are far away, zero-sized) ---
    G_BLK = 8
    G_pad = _round_up(G, G_BLK)
    if G_pad != G:
        pad_rows = jnp.tile(jnp.asarray([[0.0, 1.0e9, 1.0e9, 0.0, 0.0]], jnp.float32),
                            (G_pad - G, 1))
        tgt_pad = jnp.concatenate([tgt, pad_rows], axis=0)
    else:
        tgt_pad = tgt
    n_gt_blocks = G_pad // G_BLK
    n_candidate_k = min(10, A)

    par = pltpu.CompilerParams(dimension_semantics=("parallel",))

    # ---- pass F: global anchor_filter (1, A_pad), parallel over tiles -------
    af = pl.pallas_call(
        _filter_kernel,
        out_shape=jax.ShapeDtypeStruct((1, A_pad), jnp.float32),
        grid=(n_tiles,),
        in_specs=[
            pl.BlockSpec(memory_space=pltpu.MemorySpace.SMEM),      # stride (1,)
            pl.BlockSpec((2, tile), lambda i: (0, i)),              # grid (2, A)
            pl.BlockSpec((G_pad, 5), lambda i: (0, 0)),             # targets
        ],
        out_specs=pl.BlockSpec((1, tile), lambda i: (0, i)),
        compiler_params=par,
    )(stride_arr, grid_t, tgt_pad)

    # ---- pass B: selected anchor indices per gt, parallel over gt blocks ----
    # per-step VMEM: full-anchor inputs (resident) + (8, A_pad) intermediates
    vmem_est = (2 * 10 * A_pad * 4) + (8 * G_BLK * A_pad * 4) + (4 << 20)
    sel = pl.pallas_call(
        functools.partial(_select_kernel, n_candidate_k=n_candidate_k),
        out_shape=jax.ShapeDtypeStruct((G_pad, 128), jnp.float32),
        grid=(n_gt_blocks,),
        in_specs=[
            pl.BlockSpec(memory_space=pltpu.MemorySpace.SMEM),      # stride (1,)
            pl.BlockSpec(memory_space=pltpu.MemorySpace.SMEM),      # n_gt (1,)
            pl.BlockSpec((7, A_pad), lambda g: (0, 0)),             # predictions
            pl.BlockSpec((2, A_pad), lambda g: (0, 0)),             # grid
            pl.BlockSpec((1, A_pad), lambda g: (0, 0)),             # anchor filter
            pl.BlockSpec((G_BLK, 5), lambda g: (g, 0)),             # gt block
        ],
        out_specs=pl.BlockSpec((G_BLK, 128), lambda g: (g, 0)),
        compiler_params=pltpu.CompilerParams(
            dimension_semantics=("parallel",),
            vmem_limit_bytes=_tpu_vmem_limit(vmem_est)),
    )(stride_arr, n_gt_arr, out_t, grid_t, af, tgt_pad)

    # ---- pass C: matching / conflict resolution, parallel over anchor tiles -
    slab = pl.pallas_call(
        functools.partial(_match_kernel, n_candidate_k=n_candidate_k),
        out_shape=jax.ShapeDtypeStruct((8, A_pad), jnp.float32),
        grid=(n_tiles,),
        in_specs=[
            pl.BlockSpec(memory_space=pltpu.MemorySpace.SMEM),      # stride (1,)
            pl.BlockSpec((G_pad, 128), lambda i: (0, 0)),           # selected idx
            pl.BlockSpec((7, tile), lambda i: (0, i)),              # predictions tile
            pl.BlockSpec((2, tile), lambda i: (0, i)),              # grid tile
            pl.BlockSpec((1, tile), lambda i: (0, i)),              # filter tile
            pl.BlockSpec((G_pad, 5), lambda i: (0, 0)),             # targets
        ],
        out_specs=pl.BlockSpec((8, tile), lambda i: (0, i)),
        compiler_params=par,
    )(stride_arr, sel, out_t, grid_t, af, tgt_pad)

    fg_mask = slab[0, :A] > 0.5
    matched_gt_inds = slab[1, :A].astype(jnp.int32)
    pred_ious = slab[2, :A]
    num_fg = jnp.sum(fg_mask.astype(jnp.int32))        # cheap host-side reduce
    return fg_mask, pred_ious, matched_gt_inds, num_fg, G


if __name__ == "__main__":
    key = jax.random.PRNGKey(0)
    k1, k2, k3, k4, k5 = jax.random.split(key, 5)

    H = W = 16            # feature-map spatial size
    stride = 8.0          # FPN stride -> 128x128 image
    A = H * W             # 256 anchors (multiple of 128, lane-dense)
    G = 6                 # number of ground-truth boxes

    ys, xs = jnp.meshgrid(jnp.arange(H, dtype=jnp.float32),
                          jnp.arange(W, dtype=jnp.float32), indexing="ij")
    grid = jnp.stack([xs.reshape(-1), ys.reshape(-1)], axis=-1)   # (A, 2)

    # predictions per anchor: [cx, cy, w, h, obj_logit, cls_logit, mask_logit]
    box_xy = jax.random.uniform(k1, (A, 2), minval=0.0, maxval=H * stride)
    box_wh = jax.random.uniform(k2, (A, 2), minval=5.0, maxval=50.0)
    logits = jax.random.normal(k3, (A, 3), dtype=jnp.float32)
    output = jnp.concatenate([box_xy, box_wh, logits], axis=-1)   # (A, 7)

    # targets: [cls, cx, cy, w, h]
    gt_xy = jax.random.uniform(k4, (G, 2), minval=16.0, maxval=112.0)
    gt_wh = jax.random.uniform(k5, (G, 2), minval=10.0, maxval=48.0)
    gt_cls = jnp.zeros((G, 1), jnp.float32)
    target = jnp.concatenate([gt_cls, gt_xy, gt_wh], axis=-1)     # (G, 5)

    fg_mask, pred_ious, matched_gt_inds, num_fg, num_gt = topk_assign(
        output, target, grid, stride)
    jax.block_until_ready((fg_mask, pred_ious, matched_gt_inds, num_fg))
    print("KERNEL_OK")
</pallas_src>

<mosaic_0001>
module attributes {stable_mosaic.version = 11 : i64} {
  func.func @_filter_kernel(%arg0: i32, %arg1: memref<1xf32, #tpu.memory_space<smem>>, %arg2: memref<2x128xf32, #tpu.memory_space<vmem>>, %arg3: memref<8x5xf32, #tpu.memory_space<vmem>>, %arg4: memref<1x128xf32, #tpu.memory_space<vmem>>) attributes {dimension_semantics = [#tpu.dimension_semantics<parallel>], iteration_bounds = array<i64: 2>, scalar_prefetch = 0 : i64, scratch_operands = 0 : i64, tpu.core_type = #tpu.core_type<tc>, window_params = [{transform_indices = @transform_0, window_bounds = array<i64: 1>}, {transform_indices = @transform_1, window_bounds = array<i64: 2, 128>}, {pipeline_mode = #tpu.pipeline_mode<synchronous>, transform_indices = @transform_2, window_bounds = array<i64: 8, 5>}, {transform_indices = @transform_3, window_bounds = array<i64: 1, 128>}]} {
    %c0 = arith.constant 0 : index
    %0 = memref.load %arg1[%c0] : memref<1xf32, #tpu.memory_space<smem>>
    %c0_0 = arith.constant 0 : index
    %c0_1 = arith.constant 0 : index
    %1 = vector.load %arg2[%c0_0, %c0_1] : memref<2x128xf32, #tpu.memory_space<vmem>>, vector<2x128xf32>
    %c0_2 = arith.constant 0 : index
    %c0_3 = arith.constant 0 : index
    %2 = vector.load %arg3[%c0_2, %c0_3] : memref<8x5xf32, #tpu.memory_space<vmem>>, vector<8x5xf32>
    %3 = vector.extract_strided_slice %1 {offsets = [0, 0], sizes = [1, 128], strides = [1, 1]} : vector<2x128xf32> to vector<1x128xf32>
    %cst = arith.constant 5.000000e-01 : f32
    %4 = vector.broadcast %cst : f32 to vector<1x128xf32>
    %5 = arith.addf %3, %4 : vector<1x128xf32>
    %6 = vector.broadcast %0 : f32 to vector<1x128xf32>
    %7 = arith.mulf %5, %6 : vector<1x128xf32>
    %8 = vector.extract_strided_slice %1 {offsets = [1, 0], sizes = [1, 128], strides = [1, 1]} : vector<2x128xf32> to vector<1x128xf32>
    %cst_4 = arith.constant 5.000000e-01 : f32
    %9 = vector.broadcast %cst_4 : f32 to vector<1x128xf32>
    %10 = arith.addf %8, %9 : vector<1x128xf32>
    %11 = vector.broadcast %0 : f32 to vector<1x128xf32>
    %12 = arith.mulf %10, %11 : vector<1x128xf32>
    %cst_5 = arith.constant 1.500000e+00 : f32
    %13 = arith.mulf %0, %cst_5 : f32
    %14 = vector.extract_strided_slice %2 {offsets = [0, 1], sizes = [8, 1], strides = [1, 1]} : vector<8x5xf32> to vector<8x1xf32>
    %15 = vector.extract_strided_slice %2 {offsets = [0, 2], sizes = [8, 1], strides = [1, 1]} : vector<8x5xf32> to vector<8x1xf32>
    %16 = vector.broadcast %13 : f32 to vector<8x1xf32>
    %17 = arith.subf %14, %16 : vector<8x1xf32>
    %18 = vector.broadcast %7 : vector<1x128xf32> to vector<8x128xf32>
    %19 = vector.broadcast %17 : vector<8x1xf32> to vector<8x128xf32>
    %20 = arith.subf %18, %19 : vector<8x128xf32>
    %21 = vector.broadcast %13 : f32 to vector<8x1xf32>
    %22 = arith.addf %14, %21 : vector<8x1xf32>
    %23 = vector.broadcast %22 : vector<8x1xf32> to vector<8x128xf32>
    %24 = vector.broadcast %7 : vector<1x128xf32> to vector<8x128xf32>
    %25 = arith.subf %23, %24 : vector<8x128xf32>
    %26 = vector.broadcast %13 : f32 to vector<8x1xf32>
    %27 = arith.subf %15, %26 : vector<8x1xf32>
    %28 = vector.broadcast %12 : vector<1x128xf32> to vector<8x128xf32>
    %29 = vector.broadcast %27 : vector<8x1xf32> to vector<8x128xf32>
    %30 = arith.subf %28, %29 : vector<8x128xf32>
    %31 = vector.broadcast %13 : f32 to vector<8x1xf32>
    %32 = arith.addf %15, %31 : vector<8x1xf32>
    %33 = vector.broadcast %32 : vector<8x1xf32> to vector<8x128xf32>
    %34 = vector.broadcast %12 : vector<1x128xf32> to vector<8x128xf32>
    %35 = arith.subf %33, %34 : vector<8x128xf32>
    %cst_6 = arith.constant 0.000000e+00 : f32
    %36 = vector.broadcast %cst_6 : f32 to vector<8x128xf32>
    %37 = arith.cmpf ogt, %20, %36 : vector<8x128xf32>
    %cst_7 = arith.constant 0.000000e+00 : f32
    %38 = vector.broadcast %cst_7 : f32 to vector<8x128xf32>
    %39 = arith.cmpf ogt, %25, %38 : vector<8x128xf32>
    %40 = arith.andi %37, %39 : vector<8x128xi1>
    %cst_8 = arith.constant 0.000000e+00 : f32
    %41 = vector.broadcast %cst_8 : f32 to vector<8x128xf32>
    %42 = arith.cmpf ogt, %30, %41 : vector<8x128xf32>
    %43 = arith.andi %40, %42 : vector<8x128xi1>
    %cst_9 = arith.constant 0.000000e+00 : f32
    %44 = vector.broadcast %cst_9 : f32 to vector<8x128xf32>
    %45 = arith.cmpf ogt, %35, %44 : vector<8x128xf32>
    %46 = arith.andi %43, %45 : vector<8x128xi1>
    %47 = arith.extui %46 : vector<8x128xi1> to vector<8x128xi32>
    %cst_10 = arith.constant dense<0> : vector<128xi32>
    %48 = vector.multi_reduction <add>, %47, %cst_10 [0] : vector<8x128xi32> to vector<128xi32>
    %49 = vector.shape_cast %48 : vector<128xi32> to vector<1x128xi32>
    %c0_i32 = arith.constant 0 : i32
    %50 = vector.broadcast %c0_i32 : i32 to vector<1x128xi32>
    %51 = arith.cmpi sgt, %49, %50 : vector<1x128xi32>
    %52 = arith.extui %51 : vector<1x128xi1> to vector<1x128xi32>
    %53 = arith.sitofp %52 : vector<1x128xi32> to vector<1x128xf32>
    %c0_11 = arith.constant 0 : index
    %c0_12 = arith.constant 0 : index
    %54 = vector.load %arg4[%c0_11, %c0_12] : memref<1x128xf32, #tpu.memory_space<vmem>>, vector<1x128xf32>
    tpu.vector_store %arg4[%c0_11, %c0_12], %53 {strides = array<i32>} : memref<1x128xf32, #tpu.memory_space<vmem>>, vector<1x128xf32>,
    return
  }
  func.func @transform_0(%arg0: i32) -> i32 {
    %c0_i32 = arith.constant 0 : i32
    %c0_i32_0 = arith.constant 0 : i32
    return %c0_i32 : i32
  }
  func.func @transform_1(%arg0: i32) -> (i32, i32) {
    %c0_i32 = arith.constant 0 : i32
    %c0_i32_0 = arith.constant 0 : i32
    return %c0_i32, %arg0 : i32, i32
  }
  func.func @transform_2(%arg0: i32) -> (i32, i32) {
    %c0_i32 = arith.constant 0 : i32
    %c0_i32_0 = arith.constant 0 : i32
    %c0_i32_1 = arith.constant 0 : i32
    return %c0_i32, %c0_i32_0 : i32, i32
  }
  func.func @transform_3(%arg0: i32) -> (i32, i32) {
    %c0_i32 = arith.constant 0 : i32
    %c0_i32_0 = arith.constant 0 : i32
    return %c0_i32, %arg0 : i32, i32
  }
}

</mosaic_0001>

<bundles_post_ra>
// kernel: tpu_custom_call.1
= control target key start
LH: loop header
LB: loop body
LE: loop exit
PB: predicated region body
PF: predicated region fallthrough
CT: control target
= control target key end

     0   :  { %s719_s0 = inlined_call_operand.<no memory space> [shape: f32[1], index: 0, kind: input, shape index: {}]   ;;  %s720_s1 = inlined_call_operand.hbm [shape: f32[2,256], index: 1, kind: input, shape index: {}]   ;;  %s721_s2 = inlined_call_operand.hbm [shape: f32[8,5], index: 2, kind: input, shape index: {}]   ;;  %s722_s3 = inlined_call_operand.hbm [shape: f32[1,256], index: 3, kind: output, shape index: {}]  }
   0x1   :  { %8 = sst [smem:[#allocation2]] %s719_s0 }
   0x2   :  { %9 = vsyncpa [#allocation4], 0 }
   0x3   :  { %11 = vsyncpa [#allocation4 + $0x1], 0 }
   0x4   :  { %12 = vsyncpa [#allocation7], 0 }
   0x5   :  { %13 = vsyncpa [#allocation5], 0 }
   0x6   :  { %15 = vsyncpa [#allocation5 + $0x1], 0  ;;  %s580_s14 = smov 0   ;;  %s582_s15 = smov 0  }
   0x7   :  { %s584_s16 = smov 0   ;;  %s586_s17 = smov 0  }
   0x8 LB: > { %s601_s0 = sadd.s32 4294967295, %s550_s17   ;;  %s344_s18 = sadd.s32 4294967294, %s550_s17   ;;  %s550_s17 = sphi %s586_s17, %s732_s17   ;;  %s546_s16 = sphi %s584_s16, %s731_s16   ;;  %s542_s15 = sphi %s582_s15, %s730_s15   ;;  %s538_s14 = sphi %s580_s14, %s729_s14  }
   0x9   : > { %p62_p0 = scmp.ne.s32.totalorder %s542_s15, %s538_s14  ;;  %p63_p1 = scmp.eq.s32.totalorder %s601_s0, 0 }
   0xa   : > { %p107_p2 = scmp.eq.s32.totalorder %s601_s0, 1  ;;  %p113_p3 = scmp.eq.s32.totalorder %s344_s18, 1 }
   0xb   : > { %p610_p4 = por %p63_p1, %p62_p0  ;;  %p345_p5 = scmp.ge.s32.totalorder %s550_s17, 1 }
   0xc   : > { %p615_p6 = por %p113_p3, %p62_p0  ;;  %p120_p7 = scmp.lt.s32.totalorder %s550_s17, 3 }
   0xd   : > { %s135_s23 = sshll.u32 %s721_s2, 4  ;;  %s552_s25 = smov [#allocation6]   ;;  %s136_s23 = int_to_ptr.hbm [resolvable:$true] %s135_s23 }
   0xe   : > { %p623_p8 = pnand %p345_p5, %p120_p7  ;;  %s137_s26 = sshll.u32 %s552_s25, 4  ;;  %s138_s26 = int_to_ptr.vmem [resolvable:$true] %s137_s26 }
   0xf   : > { %s633_s27 = sadd.s32 1, %s550_s17   ;;  %s49_s28 = sadd.s32 1, %s546_s16 }
  0x10   : > { %p364_p10 = pneg %p623_p8  ;;  %s46_s29 = ssub.s32 %s550_s17, %s633_s27 }
  0x11   : > { %p47_p12 = scmp.eq.s32.totalorder %s46_s29, 0  ;;  %p56_p13 = scmp.ne.s32.totalorder %s546_s16, %s542_s15 }
  0x12   : > { %p365_p11 = pnand %p364_p10, %p63_p1  ;;  %p57_p0 = scmp.eq.s32.totalorder %s550_s17, 0 }
  0x13   : > { %s642_s30 = scalar_select %p47_p12, %s546_s16, %s49_s28  }
  0x14   : > { %367 = dma.hbm_to_vmem [thread:$0]  (!%p365_p11), %s136_s23, 128, %s138_s26, [#allocation7]  }
  0x15   : > { %p646_p3 = por %p107_p2, %p56_p13  ;;  %p377_p5 = scmp.lt.s32.totalorder %s550_s17, 2 }
  0x16   : > { %s148_s5 = sand.u32 1, %s546_s16   ;;  %s349_s6 = sshll.u32 %s550_s17, 1 }
  0x17   : > { %p58_p7 = por %p57_p0, %p56_p13  ;;  %s348_s7 = sshll.u32 %s148_s5, 1 }
  0x18   : > { %s156_s10 = scalar_lea.hbm %s720_s1, %s349_s6  ;;  %s152_s12 = scalar_lea.vmem [#allocation3], %s348_s7 }
  0x19   : > { %s158_s11 = sshll.u32 %s156_s10, 4  ;;  %s160_s13 = sshll.u32 %s152_s12, 4  ;;  %s159_s11 = int_to_ptr.hbm [resolvable:$true] %s158_s11  ;;  %s161_s13 = int_to_ptr.vmem [resolvable:$true] %s160_s13 }
  0x1a   : > { %p656_p10 = pnand %p377_p5, %p58_p7  ;;  %s149_s21 = scalar_lea.sflag [#allocation4], %s148_s5 }
  0x1b   : > { %s450_s22 = sshra.s32 %s159_s11, 4  ;;  %s457_s28 = scalar_lea.hbm %s720_s1, 4  ;;  %s451_s22 = int_to_ptr.hbm [resolvable:$true] %s450_s22 }
  0x1c   : > { %s452_s23 = scalar_lea.hbm %s451_s22, 2  ;;  %p454_p11 = pneg %p656_p10 }
  0x1d   : > { %p453_p2 = scmp.ne.s32.totalorder %s451_s22, %s452_s23  ;;  %p458_p0 = scmp.lt.s32.totalorder %s451_s22, %s720_s1 }
  0x1e   : > { %p459_p5 = scmp.lt.s32.totalorder %s457_s28, %s452_s23 }
  0x1f   : > { %p455_p12 = pnand %p454_p11, %p453_p2 }
  0x20   : > { %p460_p7 = por %p459_p5, %p458_p0 }
  0x21   : > { %p456_p13 = pneg %p455_p12 }
  0x23   : > { %p461_p9 = pnand %p460_p7, %p456_p13 }
  0x25   : > { %464 = shalt.err (!%p461_p9)
}
  0x26   : > { %371 = dma.hbm_to_vmem [thread:$0]  (!%p656_p10), %s159_s11, 32, %s161_s13, %s149_s21  }
  0x27   : > { %169 = sbr.rel (%p623_p8) target bundleno = 205 (0xcd), region = 32  ;;  %s673_s5 = sand.u32 (!%p623_p8), 1, %s542_s15  }
  0x28   : > { %s351_s7 = sshll.u32 (!%p623_p8), %s673_s5, 1  ;;  %s172_s8 = scalar_lea.sflag (!%p623_p8), [#allocation4], %s673_s5 }
  0x29   : > { %s175_s9 = scalar_lea.vmem (!%p623_p8), [#allocation3], %s351_s7 }
  0x2c   : > { %525 = dma.done.wait (%p610_p4), %s172_s8, 32  }
  0x2d   : > { %527 = vsyncadd (%p610_p4), %s172_s8, 4294967264 }
  0x2e   : > { %529 = dma.done.wait (%p63_p1), [#allocation7], 128  }
  0x2f   : > { %531 = vsyncadd (%p63_p1), [#allocation7], 4294967168  ;;  %s203_s24 = sld [smem:[#allocation2]]  ;;  %v553_v0 = vmov 2   ;;  %v554_v1 = vmov 1   ;;  %v205_v2 = vld [vmem:[#allocation6] sm:$0xff]  ;;  %s264_s12 = scalar_lea.hbm %s722_s3, %s601_s0 }
  0x30   : > { %418 = vset.pattern.permute.xlu1 %v553_v0  ;;  %417 = vset.pattern.permute.xlu0 %v554_v1  ;;  %v204_v6 = vld [vmem:[%s175_s9] sm:$0x3]  ;;  %v555_v20 = vmov 0   ;;  %s202_s13 = scalar_lea.vmem [#allocation8], %s673_s5  ;;  %s268_s21 = sshll.u32 %s264_s12, 4  ;;  %v556_v28 = vmov 0.0   ;;  %s269_s21 = int_to_ptr.hbm [resolvable:$true] %s268_s21 }
  0x31   : > { %v206_v7 = vadd.f32 0.5, %v204_v6  ;;  %s266_s18 = sshll.u32 %s202_s13, 4  ;;  %s256_s22 = scalar_lea.sflag [#allocation5], %s673_s5  ;;  %s267_s18 = int_to_ptr.vmem [resolvable:$true] %s266_s18 }
  0x32   : > { %s494_s23 = sshra.s32 %s269_s21, 4  ;;  %s500_s28 = scalar_lea.hbm %s722_s3, 2  ;;  %s495_s23 = int_to_ptr.hbm [resolvable:$true] %s494_s23 }
  0x33   : > { %s496_s25 = scalar_lea.hbm %s495_s23, 1  ;;  %p501_p9 = scmp.lt.s32.totalorder %s495_s23, %s722_s3 }
  0x34   : > { %p497_p1 = scmp.ne.s32.totalorder %s495_s23, %s496_s25  ;;  %p502_p10 = scmp.lt.s32.totalorder %s500_s28, %s496_s25 }
  0x35   : > { %s209_s10 = smul.f32 1.5, %s203_s24  ;;  %v207_v8 = vstv %s203_s24 }
  0x36   : > { %v208_v9 = vmul.f32 %v207_v8, %v206_v7  ;;  %p498_p4 = pnand %p497_p1, %p646_p3  ;;  %p503_p2 = por %p502_p10, %p501_p9 }
  0x37   : > { %v210_v3 = vstv %s209_s10 }
  0x38   : > { %v211_v4 = vsub.f32 %v205_v2, %v210_v3  ;;  %v219_v5 = vadd.f32 %v210_v3, %v205_v2  ;;  %v212_v12 = vperm.slane %v208_v9, 0  ;;  %v226_v13 = vperm.slane %v208_v9, 1  ;;  %p499_p8 = pneg %p498_p4 }
  0x3a   : > { %228 = vperm.xlu1 %418, %v211_v4   ;;  %215 = vperm.xlu0 %417, %v211_v4   ;;  %p504_p11 = pnand %p503_p2, %p499_p8 }
  0x42   : > { %233 = vperm.xlu1 %418, %v219_v5   ;;  %222 = vperm.xlu0 %417, %v219_v5  }
  0x4a   : > { %419 = vset.pattern.permute.xlu0 %v553_v0 }
  0xac   : > { %v229_v10 = vpop.permute.xlu1 %228  ;;  %v216_v11 = vpop.permute.xlu0 %215 }
  0xad   : > { %v218_v14 = vsub.f32 %v212_v12, %v216_v11  ;;  %v231_v15 = vsub.f32 %v226_v13, %v229_v10 }
  0xaf   : > { %vm237_vm0 = vcmp.gt.f32.partialorder %v218_v14, 0.0  ;;  %vm240_vm2 = vcmp.gt.f32.partialorder %v231_v15, 0.0 }
  0xb4   : > { %v234_v16 = vpop.permute.xlu1 %233  ;;  %v223_v17 = vpop.permute.xlu0 %222 }
  0xb5   : > { %v236_v18 = vsub.f32 %v234_v16, %v226_v13  ;;  %v225_v19 = vsub.f32 %v223_v17, %v212_v12 }
  0xb7   : > { %vm238_vm1 = vcmp.gt.f32.partialorder %v225_v19, 0.0  ;;  %vm242_vm4 = vcmp.gt.f32.partialorder %v236_v18, 0.0 }
  0xb8   : > { %vm239_vm3 = vmand %vm237_vm0, %vm238_vm1 }
  0xb9   : > { %vm241_vm5 = vmand %vm239_vm3, %vm240_vm2 }
  0xba   : > { %vm243_vm6 = vmand %vm241_vm5, %vm242_vm4 }
  0xbb   : > { %v244_v21 = vsel %vm243_vm6, 1, %v555_v20 }
  0xbc   : > { %v245_v22 = vrot.slane %v244_v21, 4 }
  0xbe   : > { %v246_v23 = vadd.s32 %v245_v22, %v244_v21 }
  0xc0   : > { %v247_v24 = vrot.slane %v246_v23, 2 }
  0xc2   : > { %v248_v25 = vadd.s32 %v247_v24, %v246_v23 }
  0xc4   : > { %v249_v26 = vrot.slane %v248_v25, 1 }
  0xc6   : > { %v250_v27 = vadd.s32 %v249_v26, %v248_v25 }
  0xc8   : > { %vm251_vm7 = vcmp.gt.s32.totalorder %v250_v27, 0 }
  0xc9   : > { %v353_v29 = vsel %vm251_vm7, 1.0, %v556_v28 }
  0xca   : > { %254 = vst [vmem:[%s202_s13] sm:$0x1] %v353_v29 }
  0xcb   : > { %507 = shalt.err (!%p504_p11)
}
  0xcc   : > { %362 = dma.vmem_to_hbm [thread:$0]  (%p646_p3), %s267_s18, 16, %s269_s21, %s256_s22  }
  0xcd PF: > { %s280_s5 = sand.u32 1, %s538_s14   ;;  %p728_p12 = scmp.ge.s32.totalorder %s550_s17, 2 }
  0xce   : > { %s281_s7 = scalar_lea.sflag [#allocation5], %s280_s5 }
  0xcf   : > { %p373_p13 = pnand %p728_p12, %p615_p6 }
  0xd1   : > { %p374_p0 = pneg %p373_p13 }
  0xd3   : > { %533 = dma.done.wait (%p374_p0), %s281_s7, 16  }
  0xd4   : > { %535 = vsyncadd (%p374_p0), %s281_s7, 4294967280  ;;  %p18_p5 = scmp.ge.s32.totalorder %s633_s27, 4   ;;  %s729_s14 = smov %s542_s15 }
  0xd5   : > { %s730_s15 = smov %s546_s16  ;;  %s731_s16 = smov %s642_s30 }
  0xd6   : > { %s732_s17 = smov %s633_s27  ;;  %20 = sbr.rel (!%p18_p5) target bundleno = 8 (0x8), region = 81 }
  0xdb   :  { %286 = vsyncpa [#allocation4], 1 }
  0xdc   :  { %288 = vsyncpa [#allocation4 + $0x1], 1 }
  0xdd   :  { %289 = vsyncpa [#allocation7], 1 }
  0xde   :  { %290 = vsyncpa [#allocation5], 1 }
  0xdf   :  { %292 = vsyncpa [#allocation5 + $0x1], 1 }

</bundles_post_ra>
